<compile_context>
chip_gen: v5e
topology: v5e:2x2
jax: 0.10.0
libtpu: 0.0.40
codegen_flags: <defaults>
</compile_context>

<pallas_src>
import functools

import jax
import jax.numpy as jnp
from jax.experimental import pallas as pl
from jax.experimental.pallas import tpu as pltpu


def _self_attn_kernel(x_ref, w_ref, b_ref, v_ref, o_ref, a_ref, *, t_valid):
    # x_ref: (Bb, Tp, F) native/matmul dtype   w_ref: (F, Up) same dtype as x
    # b_ref: (1, Up) f32                       v_ref: (1, Up) f32
    # o_ref: (Bb, F)                           a_ref: (Bb, Tp) f32
    Bb, Tp, F = x_ref.shape

    x = x_ref[...]                                    # native dtype, no f32 copy of x
    w = w_ref[...]
    bias = b_ref[...]                                 # (1, Up) f32
    vrow = v_ref[...]                                 # (1, Up) f32

    # One fused MXU matmul over all Bb*Tp rows; accumulate in f32.
    xw = jnp.dot(x.reshape(Bb * Tp, F), w, preferred_element_type=jnp.float32)
    ui = jnp.tanh(xw + bias).reshape(Bb, Tp, -1)      # (Bb, Tp, Up), f32

    # Scores: VPU multiply + lane reduce (cheaper than an N=1 MXU matmul).
    s = jnp.sum(ui * vrow, axis=-1)                   # (Bb, Tp), f32

    if Tp != t_valid:                                 # static: only when T was padded
        t_idx = jax.lax.broadcasted_iota(jnp.int32, (Bb, Tp), 1)
        s = jnp.where(t_idx < t_valid, s, -jnp.inf)   # exp(-inf) = 0 -> exact softmax

    # Softmax over the sequence axis (per batch row), all in f32.
    s = s - jnp.max(s, axis=-1, keepdims=True)
    e = jnp.exp(s)
    a = e / jnp.sum(e, axis=-1, keepdims=True)        # (Bb, Tp), f32

    # Pooled output: contract T on the MXU (plenty of MXU slack; kernel is HBM-bound).
    # x stays in its native dtype; accumulation is f32.  For the default f32 path the
    # a.astype(...) is a no-op, so parity with the f32 reference is exact.
    o = jnp.einsum(
        "bqt,btf->bqf", a.reshape(Bb, 1, Tp).astype(x.dtype), x,
        preferred_element_type=jnp.float32,
    )[:, 0, :]                                        # (Bb, F), f32

    o_ref[...] = o.astype(o_ref.dtype)
    a_ref[...] = a.astype(a_ref.dtype)


def _num_tensorcores():
    """Best-effort TensorCore count (v5e/v6e: 1, v7x: 2). Defaults to 1 (safe)."""
    try:
        info = pltpu.get_tpu_info()
    except Exception:
        return 1
    for name in ("num_cores", "num_tensorcores", "tensorcores_per_chip",
                 "cores_per_chip", "core_count"):
        v = getattr(info, name, None)
        if isinstance(v, int) and v >= 1:
            return v
    return 1


def _vmem_limit_bytes():
    """Explicit scoped-VMEM limit: ~3/4 of physical (96 MiB v5e/v6e, 48 MiB v7x)."""
    cap = 128 * 1024 * 1024
    try:
        cap = int(getattr(pltpu.get_tpu_info(), "vmem_capacity_bytes", cap))
    except Exception:
        pass
    return int(min(max(cap * 3 // 4, 32 * 1024 * 1024), 112 * 1024 * 1024))


def self_attn_v1(x, W, b, V, *, block_b=None, matmul_dtype=None):
    """x: (B, T, F), W: (F, U), b: (U,), V: (U, 1) -> (o: (B, F), ai: (B, T, 1))."""
    B, T, F = x.shape
    U = W.shape[1]
    out_dtype = x.dtype

    # Optional low-precision mode (v6e/v7x): cast x -- the dominant HBM traffic -- to
    # bf16.  All reductions, tanh and the softmax stay f32 inside the kernel.
    if matmul_dtype is not None:
        x = x.astype(matmul_dtype)

    # Zero-pad the units axis to a multiple of 128 lanes (exact, see header).
    Up = max(128, ((U + 127) // 128) * 128)
    W_p = jnp.zeros((F, Up), W.dtype).at[:, :U].set(W) if Up != U else W
    W_p = W_p.astype(x.dtype)        # match x so the MXU dot never upcasts the x tile
    b_p = jnp.zeros((1, Up), jnp.float32).at[:, :U].set(
        b.reshape(1, U).astype(jnp.float32))
    v_p = jnp.zeros((1, Up), jnp.float32).at[:, :U].set(
        V.reshape(1, U).astype(jnp.float32))

    # Pad T to a sublane multiple (8) so the in-kernel reshape is layout-free; padded
    # positions are masked to -inf inside the kernel, so the result is exact.
    Tp = ((T + 7) // 8) * 8
    if Tp != T:
        x = jnp.pad(x, ((0, 0), (0, Tp - T), (0, 0)))

    vmem_limit = _vmem_limit_bytes()
    x_item = jnp.dtype(x.dtype).itemsize

    if block_b is None:
        # Size by bytes: target ~4 MiB x tiles, then clamp by the per-step VMEM budget.
        row_x = Tp * F * x_item                                  # one batch row of x
        row_work = 2 * row_x + 2 * Tp * Up * 4 + 2 * (F + Tp) * 4  # x(dbl) + xw/ui + outs
        const_bytes = 2 * F * Up * x_item + 4 * Up * 4           # W (dbl-buffered) + b + V
        target_tile = 4 * 1024 * 1024
        bb_tile = max(1, target_tile // max(row_x, 1))
        avail = vmem_limit - const_bytes - 2 * 1024 * 1024       # compiler headroom
        bb_budget = max(1, avail // max(row_work, 1)) if avail > 0 else 1
        block_b = int(max(1, min(B, bb_tile, bb_budget)))

        # Megacore: only split when >1 TensorCore AND each core keeps >=2 grid steps.
        num_cores = _num_tensorcores()
        if num_cores > 1:
            desired_steps = 2 * num_cores
            if B >= desired_steps:
                block_b = min(block_b, pl.cdiv(B, desired_steps))
    block_b = int(max(1, min(block_b, B)))

    # The last grid block may be partial: its garbage rows run a harmless per-row
    # softmax (possibly NaN) but are never stored back to HBM.
    grid = (pl.cdiv(B, block_b),)

    out_shape = (
        jax.ShapeDtypeStruct((B, F), out_dtype),
        jax.ShapeDtypeStruct((B, Tp), jnp.float32),   # lane-dense ai, always f32
    )

    o, a = pl.pallas_call(
        functools.partial(_self_attn_kernel, t_valid=T),
        grid=grid,
        in_specs=[
            pl.BlockSpec((block_b, Tp, F), lambda i: (i, 0, 0)),  # x: Bb rows per step
            pl.BlockSpec((F, Up), lambda i: (0, 0)),              # W (lane padded)
            pl.BlockSpec((1, Up), lambda i: (0, 0)),              # b (lane padded)
            pl.BlockSpec((1, Up), lambda i: (0, 0)),              # V as a row (padded)
        ],
        out_specs=(
            pl.BlockSpec((block_b, F), lambda i: (i, 0)),         # o
            pl.BlockSpec((block_b, Tp), lambda i: (i, 0)),        # ai, lane-dense
        ),
        out_shape=out_shape,
        compiler_params=pltpu.CompilerParams(
            dimension_semantics=("parallel",),
            vmem_limit_bytes=vmem_limit,
        ),
    )(x, W_p, b_p, v_p)

    ai = a[:, :T].reshape(B, T, 1)
    return o, ai


def self_attn_v1_ref(x, W, b, V):
    ui = jnp.tanh(jnp.matmul(x, W) + b)
    logits = jnp.matmul(ui, V)                        # (B, T, 1)
    ai = jax.nn.softmax(logits, axis=1)
    o = jnp.sum(x * ai, axis=1)
    return o, ai


if __name__ == "__main__":
    # Small shapes consistent with the module's 3-D input: (B, T, F), units = F.
    B, T, F = 2, 8, 32
    U = F  # self.units defaults to fdim

    key = jax.random.PRNGKey(0)
    kx, kw, kv = jax.random.split(key, 3)

    x = jax.random.normal(kx, (B, T, F), dtype=jnp.float32)
    W = jax.random.normal(kw, (F, U), dtype=jnp.float32)          # torch.normal(0, 1)
    b = jnp.zeros((U,), dtype=jnp.float32)                        # torch.zeros
    V = jax.random.uniform(kv, (U, 1), dtype=jnp.float32)         # torch.rand

    o, ai = self_attn_v1(x, W, b, V)
    o = jax.block_until_ready(o)
    ai = jax.block_until_ready(ai)

    o_ref, ai_ref = self_attn_v1_ref(x, W, b, V)
    assert o.shape == (B, F) and ai.shape == (B, T, 1)
    assert jnp.allclose(o, o_ref, atol=1e-5, rtol=1e-5)
    assert jnp.allclose(ai, ai_ref, atol=1e-5, rtol=1e-5)

    print("KERNEL_OK")
</pallas_src>

<mosaic_0001>
module attributes {stable_mosaic.version = 11 : i64} {
  func.func @_self_attn_kernel(%arg0: i32, %arg1: memref<2x8x32xf32, #tpu.memory_space<vmem>>, %arg2: memref<32x128xf32, #tpu.memory_space<vmem>>, %arg3: memref<1x128xf32, #tpu.memory_space<vmem>>, %arg4: memref<1x128xf32, #tpu.memory_space<vmem>>, %arg5: memref<2x32xf32, #tpu.memory_space<vmem>>, %arg6: memref<2x8xf32, #tpu.memory_space<vmem>>) attributes {dimension_semantics = [#tpu.dimension_semantics<parallel>], iteration_bounds = array<i64: 1>, scalar_prefetch = 0 : i64, scratch_operands = 0 : i64, tpu.core_type = #tpu.core_type<tc>, window_params = [{transform_indices = @transform_0, window_bounds = array<i64: 2, 8, 32>}, {pipeline_mode = #tpu.pipeline_mode<synchronous>, transform_indices = @transform_1, window_bounds = array<i64: 32, 128>}, {pipeline_mode = #tpu.pipeline_mode<synchronous>, transform_indices = @transform_2, window_bounds = array<i64: 1, 128>}, {pipeline_mode = #tpu.pipeline_mode<synchronous>, transform_indices = @transform_3, window_bounds = array<i64: 1, 128>}, {transform_indices = @transform_4, window_bounds = array<i64: 2, 32>}, {transform_indices = @transform_5, window_bounds = array<i64: 2, 8>}]} {
    %c0 = arith.constant 0 : index
    %c0_0 = arith.constant 0 : index
    %c0_1 = arith.constant 0 : index
    %0 = vector.load %arg1[%c0, %c0_0, %c0_1] : memref<2x8x32xf32, #tpu.memory_space<vmem>>, vector<2x8x32xf32>
    %c0_2 = arith.constant 0 : index
    %c0_3 = arith.constant 0 : index
    %1 = vector.load %arg2[%c0_2, %c0_3] : memref<32x128xf32, #tpu.memory_space<vmem>>, vector<32x128xf32>
    %c0_4 = arith.constant 0 : index
    %c0_5 = arith.constant 0 : index
    %2 = vector.load %arg3[%c0_4, %c0_5] : memref<1x128xf32, #tpu.memory_space<vmem>>, vector<1x128xf32>
    %c0_6 = arith.constant 0 : index
    %c0_7 = arith.constant 0 : index
    %3 = vector.load %arg4[%c0_6, %c0_7] : memref<1x128xf32, #tpu.memory_space<vmem>>, vector<1x128xf32>
    %4 = vector.shape_cast %0 : vector<2x8x32xf32> to vector<16x32xf32>
    %cst = arith.constant dense<0.000000e+00> : vector<16x128xf32>
    %5 = tpu.matmul %4, %1, %cst {dimension_numbers = #tpu.dot_dimension_numbers<[1], [0], [0], [1], [0, 0, 1, 1], [], []>} : vector<16x32xf32>, vector<32x128xf32>, vector<16x128xf32> -> vector<16x128xf32>
    %6 = vector.broadcast %2 : vector<1x128xf32> to vector<16x128xf32>
    %7 = arith.addf %5, %6 : vector<16x128xf32>
    %8 = math.tanh %7 : vector<16x128xf32>
    %9 = vector.shape_cast %8 : vector<16x128xf32> to vector<2x8x128xf32>
    %10 = vector.shape_cast %3 : vector<1x128xf32> to vector<1x1x128xf32>
    %11 = vector.broadcast %10 : vector<1x1x128xf32> to vector<2x8x128xf32>
    %12 = arith.mulf %9, %11 : vector<2x8x128xf32>
    %cst_8 = arith.constant dense<0.000000e+00> : vector<2x8xf32>
    %13 = vector.multi_reduction <add>, %12, %cst_8 [2] : vector<2x8x128xf32> to vector<2x8xf32>
    %cst_9 = arith.constant dense<0xFF800000> : vector<2xf32>
    %14 = vector.multi_reduction <maximumf>, %13, %cst_9 [1] : vector<2x8xf32> to vector<2xf32>
    %15 = vector.shape_cast %14 : vector<2xf32> to vector<2x1xf32>
    %16 = vector.broadcast %15 : vector<2x1xf32> to vector<2x8xf32>
    %17 = arith.subf %13, %16 : vector<2x8xf32>
    %18 = math.exp %17 : vector<2x8xf32>
    %cst_10 = arith.constant dense<0.000000e+00> : vector<2xf32>
    %19 = vector.multi_reduction <add>, %18, %cst_10 [1] : vector<2x8xf32> to vector<2xf32>
    %20 = vector.shape_cast %19 : vector<2xf32> to vector<2x1xf32>
    %21 = vector.broadcast %20 : vector<2x1xf32> to vector<2x8xf32>
    %22 = arith.divf %18, %21 : vector<2x8xf32>
    %23 = vector.shape_cast %22 : vector<2x8xf32> to vector<2x1x8xf32>
    "tpu.trace_start"() <{level = 10 : i32, message = "bqt,btf->bqf"}> : () -> ()
    %cst_11 = arith.constant dense<0.000000e+00> : vector<2x1x32xf32>
    %24 = tpu.matmul %23, %0, %cst_11 {dimension_numbers = #tpu.dot_dimension_numbers<[2], [1], [1], [2], [0, 0, 0, 1, 1, 2], [0], [0]>} : vector<2x1x8xf32>, vector<2x8x32xf32>, vector<2x1x32xf32> -> vector<2x1x32xf32>
    "tpu.trace_stop"() : () -> ()
    %25 = vector.shape_cast %24 : vector<2x1x32xf32> to vector<2x32xf32>
    %c0_12 = arith.constant 0 : index
    %c0_13 = arith.constant 0 : index
    %26 = vector.load %arg5[%c0_12, %c0_13] : memref<2x32xf32, #tpu.memory_space<vmem>>, vector<2x32xf32>
    tpu.vector_store %arg5[%c0_12, %c0_13], %25 {strides = array<i32>} : memref<2x32xf32, #tpu.memory_space<vmem>>, vector<2x32xf32>,
    %c0_14 = arith.constant 0 : index
    %c0_15 = arith.constant 0 : index
    %27 = vector.load %arg6[%c0_14, %c0_15] : memref<2x8xf32, #tpu.memory_space<vmem>>, vector<2x8xf32>
    tpu.vector_store %arg6[%c0_14, %c0_15], %22 {strides = array<i32>} : memref<2x8xf32, #tpu.memory_space<vmem>>, vector<2x8xf32>,
    return
  }
  func.func @transform_0(%arg0: i32) -> (i32, i32, i32) {
    %c0_i32 = arith.constant 0 : i32
    %c0_i32_0 = arith.constant 0 : i32
    %c0_i32_1 = arith.constant 0 : i32
    return %arg0, %c0_i32, %c0_i32_0 : i32, i32, i32
  }
  func.func @transform_1(%arg0: i32) -> (i32, i32) {
    %c0_i32 = arith.constant 0 : i32
    %c0_i32_0 = arith.constant 0 : i32
    %c0_i32_1 = arith.constant 0 : i32
    return %c0_i32, %c0_i32_0 : i32, i32
  }
  func.func @transform_2(%arg0: i32) -> (i32, i32) {
    %c0_i32 = arith.constant 0 : i32
    %c0_i32_0 = arith.constant 0 : i32
    %c0_i32_1 = arith.constant 0 : i32
    return %c0_i32, %c0_i32_0 : i32, i32
  }
  func.func @transform_3(%arg0: i32) -> (i32, i32) {
    %c0_i32 = arith.constant 0 : i32
    %c0_i32_0 = arith.constant 0 : i32
    %c0_i32_1 = arith.constant 0 : i32
    return %c0_i32, %c0_i32_0 : i32, i32
  }
  func.func @transform_4(%arg0: i32) -> (i32, i32) {
    %c0_i32 = arith.constant 0 : i32
    %c0_i32_0 = arith.constant 0 : i32
    return %arg0, %c0_i32 : i32, i32
  }
  func.func @transform_5(%arg0: i32) -> (i32, i32) {
    %c0_i32 = arith.constant 0 : i32
    %c0_i32_0 = arith.constant 0 : i32
    return %arg0, %c0_i32 : i32, i32
  }
}

</mosaic_0001>

<bundles_post_ra>
// kernel: tpu_custom_call.1
= control target key start
LH: loop header
LB: loop body
LE: loop exit
PB: predicated region body
PF: predicated region fallthrough
CT: control target
= control target key end

     0   :  { %11 = vsyncpa [#allocation3], 0  ;;  %s484_s0 = inlined_call_operand.hbm [shape: f32[2,8,32], index: 0, kind: input, shape index: {}]   ;;  %s485_s1 = inlined_call_operand.hbm [shape: f32[32,128], index: 1, kind: input, shape index: {}]   ;;  %s486_s2 = inlined_call_operand.vmem [shape: f32[1,128], index: 2, kind: input, shape index: {}]   ;;  %s487_s3 = inlined_call_operand.vmem [shape: f32[1,128], index: 3, kind: input, shape index: {}]   ;;  %s488_s4 = inlined_call_operand.hbm [shape: f32[2,32], index: 4, kind: output, shape index: {0}]   ;;  %s489_s5 = inlined_call_operand.hbm [shape: f32[2,8], index: 5, kind: output, shape index: {1}]  }
   0x1   :  { %12 = vsyncpa [#allocation6], 0 }
   0x2   :  { %13 = vsyncpa [#allocation4], 0 }
   0x3   :  { %14 = vsyncpa [#allocation9], 0  ;;  %s19_s20 = sshll.u32 %s484_s0, 4  ;;  %s414_s21 = smov [#allocation2]   ;;  %s20_s20 = int_to_ptr.hbm [resolvable:$true] %s19_s20 }
   0x4   :  { %s21_s22 = sshll.u32 %s414_s21, 4  ;;  %s32_s25 = sshll.u32 %s485_s1, 4  ;;  %s22_s22 = int_to_ptr.vmem [resolvable:$true] %s21_s22  ;;  %s33_s25 = int_to_ptr.hbm [resolvable:$true] %s32_s25 }
   0x5   :  { %s415_s26 = smov 128   ;;  %s416_s27 = smov 8  }
   0x6   :  { %27 = dma.hbm_to_vmem [thread:$0]  %s20_s20, 256, %s22_s22, [#allocation3], %s415_s26, %s415_s26, %s416_s27  }
   0x7   :  { %s417_s28 = smov [#allocation5]  }
   0x8   :  { %s34_s29 = sshll.u32 %s417_s28, 4  ;;  %s35_s29 = int_to_ptr.vmem [resolvable:$true] %s34_s29 }
   0x9   :  { %40 = dma.hbm_to_vmem [thread:$0]  %s33_s25, 512, %s35_s29, [#allocation6], %s415_s26, %s415_s26, %s416_s27  }
   0xa   :  { %406 = dma.done.wait [#allocation3], 256  }
   0xb   :  { %407 = vsyncadd [#allocation3], 4294967040 }
   0xc   :  { %408 = dma.done.wait [#allocation6], 512  }
   0xd   :  { %409 = vsyncadd [#allocation6], 4294966784  ;;  %v58_v0 = vld [vmem:[#allocation5 + $0x18] sm:$0xff]  ;;  %v57_v1 = vld [vmem:[#allocation5 + $0x10] sm:$0xff]  ;;  %vm64_vm0 = vcmask 261120   ;;  %v107_v17 = vlaneseq  ;;  %vm111_vm1 = vcmask 1041409  }
   0xe   :  { %83 = vmatpush.msra.mxu0 %v58_v0  ;;  %282 = vmatpush.msra.mxu3 %v58_v0  ;;  %v53_v2 = vld [vmem:[#allocation2] sm:$0xff]  ;;  %v54_v3 = vld [vmem:[#allocation2 + $0x8] sm:$0xff]  ;;  %v56_v4 = vld [vmem:[#allocation5 + $0x8] sm:$0xff]  ;;  %vm114_vm2 = vcmask 58368   ;;  %v418_v24 = vmov 0   ;;  %vm184_vm11 = vcmask 64512  }
   0xf   :  { %202 = vmatpush.msra.mxu1 %v53_v2  ;;  %229 = vmatpush.msra.mxu2 %v54_v3  ;;  %v55_v5 = vld [vmem:[#allocation5] sm:$0xff]  ;;  %v296_v6 = vld [vmem:[%s486_s2] ss:$0 sm:$0xff]  ;;  %v463_v18 = vand.u32 127, %v107_v17  ;;  %s419_s2 = smov [#allocation8]   ;;  %s262_s9 = sshll.u32 %s489_s5, 4  ;;  %s263_s9 = int_to_ptr.hbm [resolvable:$true] %s262_s9 }
  0x10   :  { %84 = vmatpush.msra.mxu0 %v57_v1  ;;  %283 = vmatpush.msra.mxu3 %v57_v1  ;;  %v297_v10 = vld [vmem:[%s487_s3] ss:$0 sm:$0xff]  ;;  %s260_s3 = sshll.u32 %s419_s2, 4  ;;  %s420_s10 = smov [#allocation7]   ;;  %vm239_vm12 = vcmask 254976   ;;  %s261_s3 = int_to_ptr.vmem [resolvable:$true] %s260_s3 }
  0x11   :  { %294 = vset.pattern.permute.xlu2 %v418_v24  ;;  %293 = vset.pattern.permute.xlu1 %v418_v24  ;;  %s249_s11 = sshll.u32 %s420_s10, 4  ;;  %s251_s14 = sshll.u32 %s488_s4, 4  ;;  %s250_s11 = int_to_ptr.vmem [resolvable:$true] %s249_s11  ;;  %s252_s14 = int_to_ptr.hbm [resolvable:$true] %s251_s14 }
  0x12   :  { %85 = vmatpush.msra.mxu0 %v56_v4  ;;  %284 = vmatpush.msra.mxu3 %v56_v4 }
  0x13   :  { %295 = vset.pattern.permute.xlu0 %v418_v24 }
  0x14   :  { %86 = vmatpush.msra.mxu0 %v55_v5  ;;  %285 = vmatpush.msra.mxu3 %v55_v5 }
  0x15   :  { %278 = vmatmul.msk.f32.vlgmr.msra.gmra.mxu0 %vm64_vm0, %v53_v2  ;;  %279 = vmatmul.msk.f32.vlgmr.msra.gmra.mxu3 %vm64_vm0, %v54_v3 }
  0x92   :  { %v88_v7 = vpop.f32.mrf.mxu0 }
  0x93   :  { %v89_v8 = vadd.f32 %v296_v6, %v88_v7 }
  0x95   :  { %298 = vtanh.f32 %v89_v8 }
  0x98   :  { %v91_v9 = vpop.f32.mrf.mxu3 }
  0x99   :  { %v92_v11 = vadd.f32 %v296_v6, %v91_v9 }
  0x9b   :  { %v299_v12 = vpop.eup %298  ;;  %300 = vtanh.f32 %v92_v11 }
  0x9c   :  { %v99_v13 = vmul.f32 %v299_v12, %v297_v10 }
  0x9e   :  { %101 = vadd.xlane.f32.xlu0 %v99_v13 }
  0xa1   :  { %v301_v14 = vpop.eup %300 }
  0xa2   :  { %v100_v15 = vmul.f32 %v301_v14, %v297_v10 }
  0xa6   :  { %103 = vadd.xlane.f32.xlu0 %v100_v15 }
 0x111   :  { %v102_v16 = vpop.xlane.xlu0 %101 }
 0x112   :  { %v109_v20 = vperm.slane %v102_v16, %v463_v18 }
 0x119   :  { %v104_v19 = vpop.xlane.xlu0 %103 }
 0x11a   :  { %v110_v21 = vperm.slane %v104_v19, %v463_v18 }
 0x11c   :  { %v112_v22 = vsel %vm111_vm1, %v110_v21, %v109_v20 }
 0x11d   :  { %v115_v23 = vsel %vm114_vm2, %v112_v22, -inf }
 0x11e   :  { %116 = vmax.xlane.f32.xlu1 %v115_v23 }
 0x191   :  { %v117_v25 = vpop.xlane.xlu1 %116 }
 0x192   :  { %v119_v26 = vperm.slane %v117_v25, 0  ;;  %v120_v27 = vperm.slane %v117_v25, 1 }
 0x194   :  { %v123_v28 = vsub.f32 %v102_v16, %v119_v26  ;;  %v124_v29 = vsub.f32 %v104_v19, %v120_v27 }
 0x196   :  { %v125_v30 = vmul.f32 1.442695, %v123_v28  ;;  %v127_v31 = vmul.f32 1.442695, %v124_v29 }
 0x198   :  { %302 = vpow2.f32 %v125_v30 }
 0x199   :  { %304 = vpow2.f32 %v127_v31 }
 0x19e   :  { %v303_v32 = vpop.eup %302 }
 0x19f   :  { %v305_v33 = vpop.eup %304  ;;  %132 = vperm.xlu1 %293, %v303_v32  }
 0x1a0   :  { %135 = vperm.xlu2 %294, %v305_v33  }
 0x1fa   :  { %v136_v34 = vpop.permute.xlu2 %135 }
 0x1fb   :  { %v138_v36 = vperm.slane %v136_v34, %v463_v18 }
 0x211   :  { %v133_v35 = vpop.permute.xlu1 %132 }
 0x212   :  { %v137_v37 = vperm.slane %v133_v35, %v463_v18 }
 0x214   :  { %v139_v38 = vsel %vm111_vm1, %v138_v36, %v137_v37 }
 0x215   :  { %v141_v39 = vsel %vm114_vm2, %v139_v38, 0.0 }
 0x216   :  { %142 = vadd.xlane.f32.xlu2 %v141_v39 }
 0x289   :  { %v143_v40 = vpop.xlane.xlu2 %142 }
 0x28a   :  { %v145_v41 = vperm.slane %v143_v40, 0  ;;  %v146_v42 = vperm.slane %v143_v40, 1 }
 0x28c   :  { %306 = vrcp.f32 %v145_v41  ;;  %v160_v49 = vand.u32 2147483648, %v145_v41  ;;  %v175_v50 = vand.u32 2147483648, %v146_v42  ;;  %v158_v52 = vand.u32 2147483647, %v145_v41 }
 0x28d   :  { %308 = vrcp.f32 %v146_v42  ;;  %v173_v54 = vand.u32 2147483647, %v146_v42  ;;  %vm154_vm5 = vweird.f32 %v145_v41  ;;  %vm169_vm6 = vweird.f32 %v146_v42 }
 0x28e   :  { %v161_v57 = vor.u32 1.1754944e-38, %v160_v49  ;;  %v176_v58 = vor.u32 1.1754944e-38, %v175_v50  ;;  %vm159_vm9 = vcmp.eq.f32.partialorder %v158_v52, 8.507059e+37 }
 0x28f   :  { %vm174_vm10 = vcmp.eq.f32.partialorder %v173_v54, 8.507059e+37 }
 0x292   :  { %v307_v43 = vpop.eup %306 }
 0x293   :  { %v309_v44 = vpop.eup %308  ;;  %v150_v45 = vmul.f32 %v307_v43, %v145_v41  ;;  %vm155_vm3 = vweird.f32 %v307_v43 }
 0x294   :  { %v165_v46 = vmul.f32 %v309_v44, %v146_v42  ;;  %vm170_vm4 = vweird.f32 %v309_v44  ;;  %vm156_vm7 = vmor %vm154_vm5, %vm155_vm3 }
 0x295   :  { %v151_v47 = vsub.f32 1.0, %v150_v45  ;;  %vm171_vm8 = vmor %vm169_vm6, %vm170_vm4 }
 0x296   :  { %v166_v48 = vsub.f32 1.0, %v165_v46 }
 0x297   :  { %v152_v51 = vmul.f32 %v307_v43, %v151_v47 }
 0x298   :  { %v167_v53 = vmul.f32 %v309_v44, %v166_v48 }
 0x299   :  { %v153_v55 = vadd.f32 %v307_v43, %v152_v51 }
 0x29a   :  { %v168_v56 = vadd.f32 %v309_v44, %v167_v53 }
 0x29b   :  { %v157_v59 = vsel %vm156_vm7, %v307_v43, %v153_v55 }
 0x29c   :  { %v172_v60 = vsel %vm171_vm8, %v309_v44, %v168_v56  ;;  %v162_v61 = vsel %vm159_vm9, %v161_v57, %v157_v59 }
 0x29d   :  { %v177_v62 = vsel %vm174_vm10, %v176_v58, %v172_v60  ;;  %v163_v63 = vmul.f32 %v303_v32, %v162_v61 }
 0x29e   :  { %v178_v0 = vmul.f32 %v305_v33, %v177_v62 }
 0x29f   :  { %181 = vperm.xlu1 %293, %v163_v63  }
 0x2a0   :  { %209 = vperm.xlu0 %295, %v178_v0  }
 0x311   :  { %v182_v1 = vpop.permute.xlu1 %181 }
 0x312   :  { %v210_v2 = vpop.permute.xlu0 %209  ;;  %v183_v3 = vperm.slane %v182_v1, %v463_v18 }
 0x313   :  { %v211_v4 = vperm.slane %v210_v2, %v463_v18 }
 0x314   :  { %280 = vmatmul.msk.f32.vlgmr.msra.gmra.mxu1 %vm184_vm11, %v183_v3 }
 0x315   :  { %v241_v5 = vsel %vm111_vm1, %v211_v4, %v183_v3  ;;  %281 = vmatmul.msk.f32.vlgmr.msra.gmra.mxu2 %vm184_vm11, %v211_v4 }
 0x316   :  { %243 = vst.msk [vmem:[#allocation8] sm:$0x3] %vm114_vm2, %v241_v5 }
 0x317   :  { %265 = dma.vmem_to_hbm [thread:$0]  %s261_s3, 32, %s263_s9, [#allocation9]  }
 0x391   :  { %v204_v8 = vpop.f32.mrf.mxu1 }
 0x398   :  { %v231_v6 = vpop.f32.mrf.mxu2 }
 0x399   :  { %v236_v7 = vrot.slane %v231_v6, 7 }
 0x39b   :  { %v237_v9 = vsel %vm111_vm1, %v236_v7, %v204_v8 }
 0x39c   :  { %240 = vst.msk [vmem:[#allocation7] sm:$0x3] %vm239_vm12, %v237_v9 }
 0x39d   :  { %254 = dma.vmem_to_hbm [thread:$0]  %s250_s11, 32, %s252_s14, [#allocation4]  }
 0x39e   :  { %410 = dma.done.wait [#allocation4], 32  }
 0x39f   :  { %411 = vsyncadd [#allocation4], 4294967264 }
 0x3a0   :  { %412 = dma.done.wait [#allocation9], 32  }
 0x3a1   :  { %413 = vsyncadd [#allocation9], 4294967264 }
 0x3a2   :  { %274 = vsyncpa [#allocation3], 1 }
 0x3a3   :  { %275 = vsyncpa [#allocation6], 1 }
 0x3a4   :  { %276 = vsyncpa [#allocation4], 1 }
 0x3a5   :  { %277 = vsyncpa [#allocation9], 1 }

</bundles_post_ra>
